<compile_context>
chip_gen: v6e
topology: v6e:2x2x1
jax: 0.10.0
libtpu: 0.0.40
codegen_flags: <defaults>
</compile_context>

<pallas_src>
import math

import jax
import jax.numpy as jnp
from jax import lax
from jax.experimental import pallas as pl
from jax.experimental.pallas import tpu as pltpu


_BISECT_ITERS = 14   # bracket width 2^-14 ~ 6e-5: hard worst-case tau bound
_NEWTON_ITERS = 2    # exact piecewise-linear recompute; exact for generic data


def _sparsemax_body(x_ref):
    """Shared core: returns (out_values_f32, support_size_f32) for the tile."""
    x = x_ref[...].astype(jnp.float32)                 # (tm, D)
    rows, d = x.shape
    d_f = jnp.float32(d)

    m = jnp.max(x, axis=-1, keepdims=True)
    xs = x - m                                         # matches torch: X = X - max

    # ---- Phase 1: bisection bracket ------------------------------------
    # f(mid) >= 1  <=>  sum_j max(xs_j, mid) >= 1 + D*mid   (identity form)
    def bisect(i, carry):
        lo, half = carry
        mid = lo + half
        g = jnp.sum(jnp.maximum(xs, mid), axis=-1, keepdims=True)
        lo = jnp.where(g >= d_f * mid + 1.0, mid, lo)  # mid <= tau*  -> move lo up
        return lo, half * 0.5

    lo0 = jnp.full((rows, 1), -1.0, jnp.float32)
    lo, _ = lax.fori_loop(0, _BISECT_ITERS, bisect, (lo0, jnp.float32(0.5)))

    # ---- Phase 2: Newton / exact support recompute ----------------------
    # One Newton step from below == the reference tau = (sum_supp - 1)/k for
    # the current support estimate; monotone, never overshoots tau*.
    tau = lo
    k = None
    for _ in range(_NEWTON_ITERS):                     # 2 steps, unrolled
        mask = xs > tau                                # row max (=0) always in support
        k = jnp.sum(jnp.where(mask, 1.0, 0.0), axis=-1, keepdims=True)   # >= 1
        s = jnp.sum(jnp.where(mask, xs, 0.0), axis=-1, keepdims=True)
        tau = (s - 1.0) / k                            # exact divide (keep precision)

    out = jnp.maximum(xs - tau, 0.0)
    return out, k


def _sparsemax_kernel(x_ref, out_ref):
    out, _ = _sparsemax_body(x_ref)
    out_ref[...] = out.astype(out_ref.dtype)


def _sparsemax_supp_kernel(x_ref, out_ref, supp_ref):
    out, k = _sparsemax_body(x_ref)
    out_ref[...] = out.astype(out_ref.dtype)
    supp_ref[...] = k.astype(jnp.int32)


def _cdiv(a, b):
    return -(-a // b)


def _choose_tile_rows(R, D, block_rows):
    """Pick a row-tile size that (a) keeps the f32 working set (~8x one tile:
    in/out double buffers + xs + mask + temporaries) under ~16 MiB so the
    kernel fits a 32 MiB scoped-VMEM limit on every generation (incl. v7x's
    64 MiB physical VMEM), and (b) yields >= 2 balanced row blocks whenever
    R >= 64 so dimension_semantics=("parallel",) can shard across v7x's two
    TensorCores (harmless ~0.35us extra grid step on v5e/v6e)."""
    budget_bytes = 16 * 1024 * 1024
    per_row_bytes = 8 * D * 4
    cap = max(8, budget_bytes // per_row_bytes)
    tm = min(block_rows, cap, R)
    if R <= tm and R < 64:
        return R                        # single block equal to the full array
    nb = _cdiv(R, tm)
    if R >= 64:
        nb = max(nb, 2)                 # megacore: give both TCs a block
    tm = _cdiv(R, nb)
    tm = ((tm + 7) // 8) * 8            # f32 sublane granularity
    return tm


def sparsemax_pallas(x, dim=-1, k=None, return_support_size=False, block_rows=256):
    """Pallas sparsemax forward. `k` in the torch code is only a work-saving
    heuristic with an exact fallback; the kernel computes the exact full
    solution (identical for every k), so `k` is accepted and ignored."""
    del k
    orig_dtype = x.dtype
    x_last = jnp.moveaxis(x, dim, -1)   # non-last dim costs one XLA transpose
    lead_shape = x_last.shape[:-1]
    D = x_last.shape[-1]
    R = math.prod(lead_shape) if lead_shape else 1
    x2 = x_last.reshape(R, D)

    tm = _choose_tile_rows(R, D, block_rows)
    grid = (pl.cdiv(R, tm),)            # ragged tail handled by Pallas write-masking

    if return_support_size:
        kernel = _sparsemax_supp_kernel
        out_shape = (
            jax.ShapeDtypeStruct((R, D), orig_dtype),
            jax.ShapeDtypeStruct((R, 1), jnp.int32),
        )
        out_specs = (
            pl.BlockSpec((tm, D), lambda i: (i, 0)),
            pl.BlockSpec((tm, 1), lambda i: (i, 0)),
        )
    else:
        kernel = _sparsemax_kernel
        out_shape = jax.ShapeDtypeStruct((R, D), orig_dtype)
        out_specs = pl.BlockSpec((tm, D), lambda i: (i, 0))

    result = pl.pallas_call(
        kernel,
        out_shape=out_shape,
        grid=grid,
        in_specs=[pl.BlockSpec((tm, D), lambda i: (i, 0))],
        out_specs=out_specs,
        compiler_params=pltpu.CompilerParams(
            dimension_semantics=("parallel",),
            vmem_limit_bytes=32 * 1024 * 1024,
        ),
    )(x2)

    if return_support_size:
        out, supp = result
    else:
        out = result

    out = out.reshape(*lead_shape, D)
    out = jnp.moveaxis(out, -1, dim)
    if return_support_size:
        supp = supp.reshape(*lead_shape, 1)
        supp = jnp.moveaxis(supp, -1, dim)
        return out, supp
    return out


class SparsemaxPallas:
    """Mirror of the torch Sparsemax module (forward only).
    No parameters; forward hooks / relprop are autograd-side bookkeeping and
    not part of the forward computation."""

    def __init__(self, dim=-1, k=None, return_support_size=False):
        self.dim = dim
        self.k = k
        self.return_support_size = return_support_size

    def __call__(self, x):
        return sparsemax_pallas(
            x, dim=self.dim, k=self.k,
            return_support_size=self.return_support_size,
        )


def _sparsemax_ref(x, dim=-1):
    """Pure-JAX sort-based reference (same math as the torch code)."""
    xm = jnp.moveaxis(x, dim, -1)
    xs = xm - jnp.max(xm, axis=-1, keepdims=True)
    z = -jnp.sort(-xs, axis=-1)
    cs = jnp.cumsum(z, axis=-1) - 1.0
    rho = jnp.arange(1, xm.shape[-1] + 1, dtype=xm.dtype)
    supp = rho * z > cs
    kk = jnp.sum(supp, axis=-1, keepdims=True)
    tau = jnp.take_along_axis(cs, kk - 1, axis=-1) / kk.astype(xm.dtype)
    out = jnp.maximum(xs - tau, 0.0)
    return jnp.moveaxis(out, -1, dim)


if __name__ == "__main__":
    key = jax.random.PRNGKey(0)
    k0, k1 = jax.random.split(key, 2)

    # attention-score-like tensor: batch=2, seq=8, hidden=32
    x = jax.random.normal(k0, (2, 8, 32), dtype=jnp.float32)

    mod = SparsemaxPallas(dim=-1)
    p = jax.block_until_ready(mod(x))

    assert p.shape == x.shape and p.dtype == x.dtype
    # sparsemax rows form a probability distribution
    assert bool(jnp.all(p >= 0.0))
    assert bool(jnp.allclose(jnp.sum(p, axis=-1), 1.0, atol=1e-5))
    # match the sort-based reference
    assert bool(jnp.allclose(p, _sparsemax_ref(x, dim=-1), atol=1e-4)), "mismatch (dim=-1)"

    # non-default reduction dim (exercises the moveaxis glue path)
    p_d1 = jax.block_until_ready(sparsemax_pallas(x, dim=1))
    assert bool(jnp.allclose(p_d1, _sparsemax_ref(x, dim=1), atol=1e-4)), "mismatch (dim=1)"

    # return_support_size path (separate kernel variant with the extra output)
    p2, supp = sparsemax_pallas(x, dim=-1, return_support_size=True)
    jax.block_until_ready((p2, supp))
    assert supp.shape == (2, 8, 1) and supp.dtype == jnp.int32
    assert bool(jnp.all(supp >= 1)) and bool(jnp.all(supp <= x.shape[-1]))

    # larger, raggedly-tiled case: 300 rows -> 2 balanced row blocks (152/148),
    # masked tail on the second block
    y = jax.random.normal(k1, (300, 128), dtype=jnp.float32)
    q = jax.block_until_ready(sparsemax_pallas(y))
    assert bool(jnp.allclose(jnp.sum(q, axis=-1), 1.0, atol=1e-4))
    assert bool(jnp.allclose(q, _sparsemax_ref(y), atol=1e-4)), "mismatch (ragged tiling)"

    # bf16 I/O path (kernel upcasts internally; halves HBM traffic)
    yb = y.astype(jnp.bfloat16)
    qb = jax.block_until_ready(sparsemax_pallas(yb))
    assert qb.dtype == jnp.bfloat16
    assert bool(jnp.allclose(qb.astype(jnp.float32).sum(-1), 1.0, atol=2e-2))

    print("KERNEL_OK")
</pallas_src>

<mosaic_0001>
module attributes {stable_mosaic.version = 11 : i64} {
  func.func @_sparsemax_kernel(%arg0: i32, %arg1: memref<16x32xf32, #tpu.memory_space<vmem>>, %arg2: memref<16x32xf32, #tpu.memory_space<vmem>>) attributes {dimension_semantics = [#tpu.dimension_semantics<parallel>], iteration_bounds = array<i64: 1>, scalar_prefetch = 0 : i64, scratch_operands = 0 : i64, tpu.core_type = #tpu.core_type<tc>, window_params = [{transform_indices = @transform_0, window_bounds = array<i64: 16, 32>}, {transform_indices = @transform_1, window_bounds = array<i64: 16, 32>}]} {
    %c0 = arith.constant 0 : index
    %c0_0 = arith.constant 0 : index
    %0 = vector.load %arg1[%c0, %c0_0] : memref<16x32xf32, #tpu.memory_space<vmem>>, vector<16x32xf32>
    %cst = arith.constant dense<0xFF800000> : vector<16xf32>
    %1 = vector.multi_reduction <maximumf>, %0, %cst [1] : vector<16x32xf32> to vector<16xf32>
    %2 = vector.shape_cast %1 : vector<16xf32> to vector<16x1xf32>
    %3 = vector.broadcast %2 : vector<16x1xf32> to vector<16x32xf32>
    %4 = arith.subf %0, %3 : vector<16x32xf32>
    %cst_1 = arith.constant -1.000000e+00 : f32
    %5 = vector.broadcast %cst_1 : f32 to vector<16x1xf32>
    %cst_2 = arith.constant 3.200000e+01 : f32
    %cst_3 = arith.constant 5.000000e-01 : f32
    %c0_i32 = arith.constant 0 : i32
    %c14_i32 = arith.constant 14 : i32
    %6 = arith.addi %c0_i32, %c14_i32 : i32
    %c1_i32 = arith.constant 1 : i32
    %7:2 = scf.for %arg3 = %c0_i32 to %6 step %c1_i32 iter_args(%arg4 = %5, %arg5 = %cst_3) -> (vector<16x1xf32>, f32)  : i32 {
      %41 = vector.broadcast %arg5 : f32 to vector<16x1xf32>
      %42 = arith.addf %arg4, %41 : vector<16x1xf32>
      %43 = vector.broadcast %42 : vector<16x1xf32> to vector<16x32xf32>
      %44 = arith.maximumf %4, %43 : vector<16x32xf32>
      %cst_19 = arith.constant dense<0.000000e+00> : vector<16xf32>
      %45 = vector.multi_reduction <add>, %44, %cst_19 [1] : vector<16x32xf32> to vector<16xf32>
      %46 = vector.shape_cast %45 : vector<16xf32> to vector<16x1xf32>
      %47 = vector.broadcast %cst_2 : f32 to vector<16x1xf32>
      %48 = arith.mulf %47, %42 : vector<16x1xf32>
      %cst_20 = arith.constant 1.000000e+00 : f32
      %49 = vector.broadcast %cst_20 : f32 to vector<16x1xf32>
      %50 = arith.addf %48, %49 : vector<16x1xf32>
      %51 = arith.cmpf oge, %46, %50 : vector<16x1xf32>
      %52 = arith.select %51, %42, %arg4 : vector<16x1xi1>, vector<16x1xf32>
      %cst_21 = arith.constant 5.000000e-01 : f32
      %53 = arith.mulf %arg5, %cst_21 : f32
      scf.yield %52, %53 : vector<16x1xf32>, f32
    }
    %8 = vector.broadcast %7#0 : vector<16x1xf32> to vector<16x32xf32>
    %9 = arith.cmpf ogt, %4, %8 : vector<16x32xf32>
    %cst_4 = arith.constant 1.000000e+00 : f32
    %cst_5 = arith.constant 0.000000e+00 : f32
    %10 = vector.broadcast %cst_4 : f32 to vector<16x32xf32>
    %11 = vector.broadcast %cst_5 : f32 to vector<16x32xf32>
    %12 = arith.select %9, %10, %11 : vector<16x32xi1>, vector<16x32xf32>
    %cst_6 = arith.constant dense<0.000000e+00> : vector<16xf32>
    %13 = vector.multi_reduction <add>, %12, %cst_6 [1] : vector<16x32xf32> to vector<16xf32>
    %14 = vector.shape_cast %13 : vector<16xf32> to vector<16x1xf32>
    %cst_7 = arith.constant 0.000000e+00 : f32
    %15 = vector.broadcast %cst_7 : f32 to vector<16x32xf32>
    %16 = arith.select %9, %4, %15 : vector<16x32xi1>, vector<16x32xf32>
    %cst_8 = arith.constant dense<0.000000e+00> : vector<16xf32>
    %17 = vector.multi_reduction <add>, %16, %cst_8 [1] : vector<16x32xf32> to vector<16xf32>
    %18 = vector.shape_cast %17 : vector<16xf32> to vector<16x1xf32>
    %cst_9 = arith.constant 1.000000e+00 : f32
    %19 = vector.broadcast %cst_9 : f32 to vector<16x1xf32>
    %20 = arith.subf %18, %19 : vector<16x1xf32>
    %21 = arith.divf %20, %14 : vector<16x1xf32>
    %22 = vector.broadcast %21 : vector<16x1xf32> to vector<16x32xf32>
    %23 = arith.cmpf ogt, %4, %22 : vector<16x32xf32>
    %cst_10 = arith.constant 1.000000e+00 : f32
    %cst_11 = arith.constant 0.000000e+00 : f32
    %24 = vector.broadcast %cst_10 : f32 to vector<16x32xf32>
    %25 = vector.broadcast %cst_11 : f32 to vector<16x32xf32>
    %26 = arith.select %23, %24, %25 : vector<16x32xi1>, vector<16x32xf32>
    %cst_12 = arith.constant dense<0.000000e+00> : vector<16xf32>
    %27 = vector.multi_reduction <add>, %26, %cst_12 [1] : vector<16x32xf32> to vector<16xf32>
    %28 = vector.shape_cast %27 : vector<16xf32> to vector<16x1xf32>
    %cst_13 = arith.constant 0.000000e+00 : f32
    %29 = vector.broadcast %cst_13 : f32 to vector<16x32xf32>
    %30 = arith.select %23, %4, %29 : vector<16x32xi1>, vector<16x32xf32>
    %cst_14 = arith.constant dense<0.000000e+00> : vector<16xf32>
    %31 = vector.multi_reduction <add>, %30, %cst_14 [1] : vector<16x32xf32> to vector<16xf32>
    %32 = vector.shape_cast %31 : vector<16xf32> to vector<16x1xf32>
    %cst_15 = arith.constant 1.000000e+00 : f32
    %33 = vector.broadcast %cst_15 : f32 to vector<16x1xf32>
    %34 = arith.subf %32, %33 : vector<16x1xf32>
    %35 = arith.divf %34, %28 : vector<16x1xf32>
    %36 = vector.broadcast %35 : vector<16x1xf32> to vector<16x32xf32>
    %37 = arith.subf %4, %36 : vector<16x32xf32>
    %cst_16 = arith.constant 0.000000e+00 : f32
    %38 = vector.broadcast %cst_16 : f32 to vector<16x32xf32>
    %39 = arith.maximumf %37, %38 : vector<16x32xf32>
    %c0_17 = arith.constant 0 : index
    %c0_18 = arith.constant 0 : index
    %40 = vector.load %arg2[%c0_17, %c0_18] : memref<16x32xf32, #tpu.memory_space<vmem>>, vector<16x32xf32>
    tpu.vector_store %arg2[%c0_17, %c0_18], %39 {strides = array<i32>} : memref<16x32xf32, #tpu.memory_space<vmem>>, vector<16x32xf32>,
    return
  }
  func.func @transform_0(%arg0: i32) -> (i32, i32) {
    %c0_i32 = arith.constant 0 : i32
    %c0_i32_0 = arith.constant 0 : i32
    return %arg0, %c0_i32 : i32, i32
  }
  func.func @transform_1(%arg0: i32) -> (i32, i32) {
    %c0_i32 = arith.constant 0 : i32
    %c0_i32_0 = arith.constant 0 : i32
    return %arg0, %c0_i32 : i32, i32
  }
}

</mosaic_0001>

<bundles_post_ra>
// kernel: tpu_custom_call.1
= control target key start
LH: loop header
LB: loop body
LE: loop exit
PB: predicated region body
PF: predicated region fallthrough
CT: control target
= control target key end

     0   :  { %6 = vsyncpa [#allocation3], 0  ;;  %s340_s0 = inlined_call_operand.hbm [shape: f32[16,32], index: 0, kind: input, shape index: {}]   ;;  %s341_s1 = inlined_call_operand.hbm [shape: f32[16,32], index: 1, kind: output, shape index: {}]  }
   0x1   :  { %7 = vsyncpa [#allocation4], 0  ;;  %s273_s6 = smov [#allocation2]  }
   0x2   :  { %s13_s7 = sshll.u32 %s273_s6, 4  ;;  %s14_s7 = int_to_ptr.vmem [resolvable:$true] %s13_s7 }
   0x3   :  { %s205_s8 = scalar_lea.vmem %s14_s7, 256  ;;  %p210_p1 = scmp.lt.s32.totalorder %s14_s7, %s14_s7 }
   0x4   :  { %p206_p0 = scmp.ne.s32.totalorder %s14_s7, %s205_s8  ;;  %p211_p2 = scmp.lt.s32.totalorder %s205_s8, %s205_s8 }
   0x6   :  { %p212_p3 = por %p211_p2, %p210_p1 }
   0x8   :  { %p213_p4 = pnand %p212_p3, %p206_p0 }
   0xa   :  { %216 = shalt.err (!%p213_p4)
}
   0xb   :  { %s274_s9 = smov 128   ;;  %s275_s10 = smov 8  }
   0xc   :  { %19 = dma.hbm_to_vmem [thread:$0]  %s340_s0, 256, %s14_s7, [#allocation3], %s274_s9, %s274_s9, %s275_s10  }
   0xd   :  { %253 = dma.done.wait [#allocation3], 256  }
   0xe   :  { %254 = vsyncadd [#allocation3], 4294967040  ;;  %vm25_vm0 = vcmask 261120   ;;  %v23_v0 = vld [vmem:[#allocation2] sm:$0xff]  ;;  %v24_v1 = vld [vmem:[#allocation2 + $0x8] sm:$0xff]  ;;  %s300_s13 = smov 0.5  }
   0xf   :  { %v26_v2 = vsel %vm25_vm0, %v23_v0, -inf  ;;  %v29_v3 = vsel %vm25_vm0, %v24_v1, -inf  ;;  %v261_v8 = vmov -1.0   ;;  %v265_v9 = vmov -1.0   ;;  %s302_s0 = smov 0  }
  0x10   :  { %27 = vmax.xlane.f32.xlu0 %v26_v2 }
  0x14   :  { %30 = vmax.xlane.f32.xlu0 %v29_v3 }
  0x99   :  { %v28_v4 = vpop.xlane.xlu0 %27 }
  0x9a   :  { %v296_v5 = vsub.f32 %v23_v0, %v28_v4 }
  0x9d   :  { %v31_v6 = vpop.xlane.xlu0 %30 }
  0x9e   :  { %v298_v7 = vsub.f32 %v24_v1, %v31_v6 }
  0x9f LB: > { %v43_v10 = vstv %s259_s13  ;;  %s62_s13 = smul.f32 0.5, %s259_s13   ;;  %s39_s0 = sadd.s32 1, %s271_s0   ;;  %s271_s0 = sphi %s302_s0, %s39_s0   ;;  %v267_v9 = vphi %v265_v9, %v266_v9   ;;  %v263_v8 = vphi %v261_v8, %v262_v8   ;;  %s259_s13 = sphi %s300_s13, %s62_s13  }
  0xa0   : > { %v44_v11 = vadd.f32 %v267_v9, %v43_v10  ;;  %v45_v12 = vadd.f32 %v263_v8, %v43_v10  ;;  %p36_p5 = scmp.ge.s32.totalorder %s39_s0, 14  }
  0xa1   :  { %v276_v25 = vmov (%p36_p5), 0.0   ;;  %s277_s14 = smov (%p36_p5), [#allocation5]  }
  0xa2   : > { %v46_v13 = vmax.f32 %v296_v5, %v44_v11  ;;  %v47_v14 = vmax.f32 %v298_v7, %v45_v12  ;;  %v54_v17 = vmul.f32 32.0, %v44_v11  ;;  %v55_v19 = vmul.f32 32.0, %v45_v12  ;;  %s122_s15 = sshll.u32 (%p36_p5), %s277_s14, 4  ;;  %s123_s15 = int_to_ptr.vmem [resolvable:$true] %s122_s15 }
  0xa3   :  { %s217_s16 = scalar_lea.vmem (%p36_p5), %s123_s15, 256  ;;  %p222_p7 = scmp.lt.s32.totalorder (%p36_p5), %s123_s15, %s123_s15 }
  0xa4   : > { %v48_v15 = vsel %vm25_vm0, %v46_v13, 0.0  ;;  %v51_v16 = vsel %vm25_vm0, %v47_v14, 0.0  ;;  %v56_v18 = vadd.f32 1.0, %v54_v17  ;;  %v57_v21 = vadd.f32 1.0, %v55_v19  ;;  %p218_p6 = scmp.ne.s32.totalorder (%p36_p5), %s123_s15, %s217_s16  ;;  %p223_p8 = scmp.lt.s32.totalorder (%p36_p5), %s217_s16, %s217_s16 }
  0xa5   : > { %49 = vadd.xlane.f32.xlu0 %v48_v15 }
  0xa6   :  { %p224_p9 = por (%p36_p5), %p223_p8, %p222_p7 }
  0xa8   :  { %p225_p10 = pnand (%p36_p5), %p224_p9, %p218_p6 }
  0xa9   : > { %52 = vadd.xlane.f32.xlu0 %v51_v16 }
 0x12e   : > { %v50_v20 = vpop.xlane.xlu0 %49 }
 0x12f   : > { %vm58_vm1 = vcmp.ge.f32.partialorder %v50_v20, %v56_v18 }
 0x130   : > { %v60_v22 = vsel %vm58_vm1, %v44_v11, %v267_v9  }
 0x131   : > { %v266_v9 = vmov %v60_v22   ;;  %38 = sbr.rel (!%p36_p5) target bundleno = 159 (0x9f), region = 35  ;;  %vm63_vm3 = vcmp.gt.f32.partialorder (%p36_p5), %v296_v5, %v60_v22 }
 0x132   : > { %v53_v23 = vpop.xlane.xlu0 %52  ;;  %v65_v26 = vsel (%p36_p5), %vm63_vm3, 1.0, %v276_v25  ;;  %v73_v28 = vsel (%p36_p5), %vm63_vm3, %v296_v5, 0.0 }
 0x133   : > { %vm59_vm2 = vcmp.ge.f32.partialorder %v53_v23, %v57_v21  ;;  %v67_v30 = vsel (%p36_p5), %vm25_vm0, %v65_v26, 0.0  ;;  %v75_v31 = vsel (%p36_p5), %vm25_vm0, %v73_v28, 0.0 }
 0x134   : > { %v61_v24 = vsel %vm59_vm2, %v45_v12, %v263_v8   ;;  %68 = vadd.xlane.f32.xlu0 (%p36_p5), %v67_v30  ;;  %76 = vadd.xlane.f32.xlu1 (%p36_p5), %v75_v31 }
 0x135   : > { %v262_v8 = vmov %v61_v24   ;;  %vm64_vm4 = vcmp.gt.f32.partialorder (%p36_p5), %v298_v7, %v61_v24 }
 0x136   :  { %v66_v27 = vsel %vm64_vm4, 1.0, %v276_v25  ;;  %v74_v29 = vsel %vm64_vm4, %v298_v7, 0.0 }
 0x137   :  { %v70_v32 = vsel %vm25_vm0, %v66_v27, 0.0  ;;  %v78_v33 = vsel %vm25_vm0, %v74_v29, 0.0 }
 0x138   :  { %71 = vadd.xlane.f32.xlu0 %v70_v32  ;;  %79 = vadd.xlane.f32.xlu1 %v78_v33 }
 0x1bd   :  { %v69_v34 = vpop.xlane.xlu0 %68  ;;  %v77_v36 = vpop.xlane.xlu1 %76 }
 0x1be   :  { %189 = vrcp.f32 %v69_v34  ;;  %v148_v37 = vadd.f32 -1.0, %v77_v36 }
 0x1c1   :  { %v72_v35 = vpop.xlane.xlu0 %71  ;;  %v80_v38 = vpop.xlane.xlu1 %79 }
 0x1c2   :  { %191 = vrcp.f32 %v72_v35  ;;  %v149_v40 = vadd.f32 -1.0, %v80_v38 }
 0x1cb   :  { %v190_v39 = vpop.eup %189 }
 0x1cc   :  { %v84_v41 = vmul.f32 %v190_v39, %v148_v37 }
 0x1ce   :  { %vm87_vm5 = vcmp.gt.f32.partialorder %v296_v5, %v84_v41 }
 0x1cf   :  { %v192_v42 = vpop.eup %191  ;;  %v89_v43 = vsel %vm87_vm5, 1.0, %v276_v25  ;;  %v97_v46 = vsel %vm87_vm5, %v296_v5, 0.0 }
 0x1d0   :  { %v91_v44 = vsel %vm25_vm0, %v89_v43, 0.0  ;;  %v86_v45 = vmul.f32 %v192_v42, %v149_v40  ;;  %v99_v48 = vsel %vm25_vm0, %v97_v46, 0.0 }
 0x1d1   :  { %92 = vadd.xlane.f32.xlu0 %v91_v44 }
 0x1d2   :  { %vm88_vm6 = vcmp.gt.f32.partialorder %v298_v7, %v86_v45 }
 0x1d3   :  { %v90_v47 = vsel %vm88_vm6, 1.0, %v276_v25  ;;  %v98_v50 = vsel %vm88_vm6, %v298_v7, 0.0 }
 0x1d4   :  { %v94_v49 = vsel %vm25_vm0, %v90_v47, 0.0  ;;  %v102_v51 = vsel %vm25_vm0, %v98_v50, 0.0 }
 0x1d5   :  { %100 = vadd.xlane.f32.xlu0 %v99_v48  ;;  %95 = vadd.xlane.f32.xlu1 %v94_v49 }
 0x1d9   :  { %103 = vadd.xlane.f32.xlu1 %v102_v51 }
 0x25a   :  { %v93_v52 = vpop.xlane.xlu0 %92 }
 0x25b   :  { %193 = vrcp.f32 %v93_v52 }
 0x25e   :  { %v96_v53 = vpop.xlane.xlu1 %95  ;;  %v101_v54 = vpop.xlane.xlu0 %100 }
 0x25f   :  { %195 = vrcp.f32 %v96_v53  ;;  %v150_v55 = vadd.f32 -1.0, %v101_v54 }
 0x262   :  { %v104_v57 = vpop.xlane.xlu1 %103 }
 0x263   :  { %v151_v60 = vadd.f32 -1.0, %v104_v57 }
 0x268   :  { %v194_v56 = vpop.eup %193 }
 0x269   :  { %v108_v58 = vmul.f32 %v194_v56, %v150_v55 }
 0x26b   :  { %v111_v59 = vsub.f32 %v296_v5, %v108_v58 }
 0x26c   :  { %v196_v61 = vpop.eup %195 }
 0x26d   :  { %v110_v62 = vmul.f32 %v196_v61, %v151_v60  ;;  %v113_v63 = vmax.f32 %v111_v59, 0.0 }
 0x26f   :  { %v112_v0 = vsub.f32 %v298_v7, %v110_v62  ;;  %115 = vst.msk [vmem:[#allocation5] sm:$0xff] %vm25_vm0, %v113_v63 }
 0x271   :  { %v114_v1 = vmax.f32 %v112_v0, 0.0 }
 0x273   :  { %116 = vst.msk [vmem:[#allocation5 + $0x8] sm:$0xff] %vm25_vm0, %v114_v1 }
 0x274   :  { %228 = shalt.err (!%p225_p10)
}
 0x275   :  { %128 = dma.vmem_to_hbm [thread:$0]  %s123_s15, 256, %s341_s1, [#allocation4], %s274_s9, %s274_s9, %s275_s10  }
 0x276   :  { %255 = dma.done.wait [#allocation4], 256  }
 0x277   :  { %256 = vsyncadd [#allocation4], 4294967040 }
 0x278   :  { %132 = vsyncpa [#allocation3], 1 }
 0x279   :  { %133 = vsyncpa [#allocation4], 1 }

</bundles_post_ra>
